<compile_context>
chip_gen: v6e
topology: v6e:2x2x1
jax: 0.10.0
libtpu: 0.0.40
codegen_flags: <defaults>
</compile_context>

<pallas_src>
import jax
import jax.numpy as jnp
from jax.experimental import pallas as pl
from jax.experimental.pallas import tpu as pltpu


_LANE = 128


def _round_up(n, m):
    return ((n + m - 1) // m) * m


def linear_kernel(x_ref, w_ref, b_ref, o_ref):
    # x_ref: (IN, tile_B) VMEM  -- batch on lanes (lane-dense)
    # w_ref: (IN, 1)     VMEM  -- W^T column, broadcasts over lanes
    # b_ref: (1, 1)      SMEM  -- scalar bias
    # o_ref: (1, tile_B) VMEM  -- lane-dense output row
    x = x_ref[...]                                   # (IN, tile_B)
    w = w_ref[...]                                   # (IN, 1)
    b = b_ref[0, 0]
    # VPU multiply + XLU sublane reduce; no MXU pass for K=10, OUT=1.
    acc = jnp.sum(x * w, axis=0, keepdims=True)      # (1, tile_B) f32
    o_ref[...] = (acc + b).astype(o_ref.dtype)


def linear_forward(x, weight, bias, *, b_tile=65536, small_batch_max=4096):
    """x: (B, IN) f32, weight: (OUT, IN)=(1, IN), bias: (OUT,)=(1,) -> (B, 1)."""
    B, IN = x.shape
    OUT = weight.shape[0]
    assert OUT == 1, "PyTorchModel has a single output feature"

    w_col = weight.reshape(IN, 1).astype(jnp.float32)    # (IN, 1) = W^T column
    b2d = bias.reshape(1, 1).astype(jnp.float32)          # (1, 1) scalar for SMEM

    # Batch-on-lanes layout: one wrapper-side transpose; everything downstream
    # (vregs, DMAs, output stores) is lane-dense.
    x_t = x.T                                              # (IN, B)

    if B <= small_batch_max:
        # Small-batch path: pad B to one lane multiple, whole arrays in VMEM.
        # TODO(synk): at tiny B this standalone call is pure launch overhead;
        # in a real model this head should be fused into its consumer kernel.
        b_pad = _round_up(max(B, _LANE), _LANE)
        x_t = jnp.pad(x_t, ((0, 0), (0, b_pad - B)))
        out = pl.pallas_call(
            linear_kernel,
            out_shape=jax.ShapeDtypeStruct((1, b_pad), x.dtype),
            in_specs=[
                pl.BlockSpec(memory_space=pltpu.MemorySpace.VMEM),
                pl.BlockSpec(memory_space=pltpu.MemorySpace.VMEM),
                pl.BlockSpec(memory_space=pltpu.MemorySpace.SMEM),
            ],
            out_specs=pl.BlockSpec(memory_space=pltpu.MemorySpace.VMEM),
        )(x_t, w_col, b2d)
    else:
        # Large-batch path: big lane-dense B tiles, padded to a tile multiple
        # (no divisibility fallback). Keep at least 2 grid steps so the
        # "parallel" axis can shard across both TensorCores on v7x.
        tile = max(_LANE, min(b_tile, _round_up(pl.cdiv(B, 2), _LANE)))
        b_pad = _round_up(B, tile)
        x_t = jnp.pad(x_t, ((0, 0), (0, b_pad - B)))
        out = pl.pallas_call(
            linear_kernel,
            out_shape=jax.ShapeDtypeStruct((1, b_pad), x.dtype),
            grid=(b_pad // tile,),
            in_specs=[
                pl.BlockSpec((IN, tile), lambda i: (0, i)),
                pl.BlockSpec((IN, 1), lambda i: (0, 0)),
                pl.BlockSpec(memory_space=pltpu.MemorySpace.SMEM),
            ],
            out_specs=pl.BlockSpec((1, tile), lambda i: (0, i)),
            compiler_params=pltpu.CompilerParams(
                dimension_semantics=("parallel",),
                # Above the default scoped limits (16 MiB v5e / 32 MiB
                # v6e & v7x) but safely under v7x's 64 MiB physical VMEM.
                vmem_limit_bytes=48 * 1024 * 1024,
            ),
        )(x_t, w_col, b2d)

    # (1, B) holds the same contiguous bytes as (B, 1): slice off lane padding
    # and do a cheap reshape back to the nn.Linear output layout.
    return out[:, :B].reshape(B, OUT)


if __name__ == "__main__":
    key = jax.random.PRNGKey(0)
    k_x, k_w, k_b, k_x2 = jax.random.split(key, 4)

    B, IN, OUT = 8, 10, 1

    # Deterministic parameter init (matches nn.Linear's U(-1/sqrt(in), 1/sqrt(in))).
    bound = 1.0 / jnp.sqrt(jnp.float32(IN))
    weight = jax.random.uniform(k_w, (OUT, IN), jnp.float32, -bound, bound)  # torch (out, in)
    bias = jax.random.uniform(k_b, (OUT,), jnp.float32, -bound, bound)

    # Small-batch (gridless) path.
    x = jax.random.normal(k_x, (B, IN), jnp.float32)
    out = jax.block_until_ready(linear_forward(x, weight, bias))
    ref = x @ weight.T + bias
    assert out.shape == (B, OUT)
    assert jnp.allclose(out, ref, atol=1e-5, rtol=1e-5)

    # Exercise the gridded large-batch path at a modest size (tail-padded B).
    B2 = 1000
    x2 = jax.random.normal(k_x2, (B2, IN), jnp.float32)
    out2 = jax.block_until_ready(
        linear_forward(x2, weight, bias, b_tile=256, small_batch_max=256)
    )
    ref2 = x2 @ weight.T + bias
    assert out2.shape == (B2, OUT)
    assert jnp.allclose(out2, ref2, atol=1e-5, rtol=1e-5)

    print("KERNEL_OK")
</pallas_src>

<mosaic_0001>
module attributes {stable_mosaic.version = 11 : i64} {
  func.func @linear_kernel(%arg0: memref<10x128xf32, #tpu.memory_space<vmem>>, %arg1: memref<10x1xf32, #tpu.memory_space<vmem>>, %arg2: memref<1x1xf32, #tpu.memory_space<smem>>, %arg3: memref<1x128xf32, #tpu.memory_space<vmem>>) attributes {dimension_semantics = [], scalar_prefetch = 0 : i64, scratch_operands = 0 : i64, tpu.core_type = #tpu.core_type<tc>} {
    %c0 = arith.constant 0 : index
    %c0_0 = arith.constant 0 : index
    %0 = vector.load %arg0[%c0, %c0_0] : memref<10x128xf32, #tpu.memory_space<vmem>>, vector<10x128xf32>
    %c0_1 = arith.constant 0 : index
    %c0_2 = arith.constant 0 : index
    %1 = vector.load %arg1[%c0_1, %c0_2] : memref<10x1xf32, #tpu.memory_space<vmem>>, vector<10x1xf32>
    %c0_3 = arith.constant 0 : index
    %c0_4 = arith.constant 0 : index
    %2 = memref.load %arg2[%c0_3, %c0_4] : memref<1x1xf32, #tpu.memory_space<smem>>
    %3 = vector.broadcast %1 : vector<10x1xf32> to vector<10x128xf32>
    %4 = arith.mulf %0, %3 : vector<10x128xf32>
    %cst = arith.constant dense<0.000000e+00> : vector<128xf32>
    %5 = vector.multi_reduction <add>, %4, %cst [0] : vector<10x128xf32> to vector<128xf32>
    %6 = vector.shape_cast %5 : vector<128xf32> to vector<1x128xf32>
    %7 = vector.broadcast %2 : f32 to vector<1x128xf32>
    %8 = arith.addf %6, %7 : vector<1x128xf32>
    %c0_5 = arith.constant 0 : index
    %c0_6 = arith.constant 0 : index
    %9 = vector.load %arg3[%c0_5, %c0_6] : memref<1x128xf32, #tpu.memory_space<vmem>>, vector<1x128xf32>
    tpu.vector_store %arg3[%c0_5, %c0_6], %8 {strides = array<i32>} : memref<1x128xf32, #tpu.memory_space<vmem>>, vector<1x128xf32>,
    return
  }
}

</mosaic_0001>

<bundles_post_ra>
// kernel: tpu_custom_call.1
= control target key start
LH: loop header
LB: loop body
LE: loop exit
PB: predicated region body
PF: predicated region fallthrough
CT: control target
= control target key end

     0   :  { %v84_v1 = vmov 0   ;;  %s124_s0 = inlined_call_operand.vmem [shape: f32[10,128], index: 0, kind: input, shape index: {}]   ;;  %s125_s1 = inlined_call_operand.vmem [shape: f32[10,1], index: 1, kind: input, shape index: {}]   ;;  %s126_s2 = inlined_call_operand.<no memory space> [shape: f32[1,1], index: 2, kind: input, shape index: {}]   ;;  %s127_s3 = inlined_call_operand.hbm [shape: f32[1,128], index: 3, kind: output, shape index: {}]  }
   0x1   :  { %v19_v0 = vld [vmem:[%s125_s1 + $0x8] sm:$0x3]  ;;  %61 = vset.pattern.permute.xlu0 %v84_v1 }
   0x2   :  { %9 = vsyncpa [#allocation4], 0  ;;  %28 = vperm.xlu0 %61, %v19_v0   ;;  %v18_v2 = vld [vmem:[%s125_s1] sm:$0xff]  ;;  %v17_v3 = vld [vmem:[%s124_s0 + $0x8] sm:$0x3]  ;;  %vm33_vm0 = vcmask 1041408   ;;  %v42_v16 = vstv %s126_s2 }
   0x3   :  { %v16_v6 = vld [vmem:[%s124_s0] sm:$0xff]  ;;  %s85_s21 = smov [#allocation3]  }
   0x4   :  { %s51_s22 = sshll.u32 %s85_s21, 4  ;;  %s52_s22 = int_to_ptr.vmem [resolvable:$true] %s51_s22 }
   0x5   :  { %s62_s0 = scalar_lea.vmem %s52_s22, 16  ;;  %s66_s23 = scalar_lea.vmem %s52_s22, 32 }
   0x6   :  { %23 = vperm.xlu0 %61, %v18_v2   ;;  %p63_p0 = scmp.ne.s32.totalorder %s52_s22, %s62_s0  ;;  %p67_p1 = scmp.lt.s32.totalorder %s52_s22, %s52_s22 }
   0x7   :  { %p68_p2 = scmp.lt.s32.totalorder %s66_s23, %s62_s0 }
   0x9   :  { %p69_p3 = por %p68_p2, %p67_p1 }
   0xb   :  { %p70_p4 = pnand %p69_p3, %p63_p0 }
  0x7d   :  { %v29_v4 = vpop.permute.xlu0 %28 }
  0x7e   :  { %v32_v5 = vmul.f32 %v29_v4, %v17_v3 }
  0x80   :  { %v34_v9 = vsel %vm33_vm0, %v32_v5, 0.0 }
  0x81   :  { %v24_v7 = vpop.permute.xlu0 %23 }
  0x82   :  { %v31_v8 = vmul.f32 %v24_v7, %v16_v6 }
  0x84   :  { %v35_v10 = vadd.f32 %v34_v9, %v31_v8 }
  0x86   :  { %v36_v11 = vrot.slane %v35_v10, 4 }
  0x88   :  { %v37_v12 = vadd.f32 %v36_v11, %v35_v10 }
  0x8a   :  { %v38_v13 = vrot.slane %v37_v12, 2 }
  0x8c   :  { %v39_v14 = vadd.f32 %v38_v13, %v37_v12 }
  0x8e   :  { %v40_v15 = vrot.slane %v39_v14, 1 }
  0x90   :  { %v41_v17 = vadd.f32 %v40_v15, %v39_v14 }
  0x92   :  { %v43_v18 = vadd.f32 %v42_v16, %v41_v17 }
  0x94   :  { %44 = vst [vmem:[#allocation3] sm:$0x1] %v43_v18 }
  0x95   :  { %73 = shalt.err (!%p70_p4)
}
  0x96   :  { %54 = dma.vmem_to_hbm [thread:$0]  %s52_s22, 16, %s127_s3, [#allocation4]  }
  0x97   :  { %82 = dma.done.wait [#allocation4], 16  }
  0x98   :  { %83 = vsyncadd [#allocation4], 4294967280 }
  0x99   :  { %58 = vsyncpa [#allocation4], 1 }

</bundles_post_ra>
